<compile_context>
chip_gen: v7x
topology: tpu7x:2x2x1
jax: 0.10.0
libtpu: 0.0.40
codegen_flags: <defaults>
</compile_context>

<pallas_src>
import numpy as np
import jax
import jax.numpy as jnp
from jax.experimental import pallas as pl
from jax.experimental.pallas import tpu as pltpu


def _cdiv(a, b):
    return -(-a // b)


# ---------------------------------------------------------------------------
# Kernels
# ---------------------------------------------------------------------------

def _conv1x1_mxu_kernel(x_ref, w_ref, b_ref, o_ref):
    """General path: one MXU matmul per lane-dense (C, T) spatial tile.

    x_ref/o_ref: (C, T); w_ref: (C, C) effective weight (resident, x dtype);
    b_ref: (C, 1) effective bias in f32.  Accumulation is f32.
    """
    y = jnp.dot(w_ref[...], x_ref[...], preferred_element_type=jnp.float32)
    o_ref[...] = (y + b_ref[...]).astype(o_ref.dtype)


def _make_conv1x1_vpu_kernel(c):
    """Small-channel path (C below the sublane tile): C^2 unrolled VPU FMAs with
    SMEM scalar weights.  Avoids an MXU matmul padded from K=M=C to 128/256 and
    its result-FIFO latency, and wastes no sublanes on weight tiles."""

    def kernel(x_ref, w_ref, b_ref, o_ref):
        # x_ref/o_ref: (C, T) VMEM; w_ref: (C, C) SMEM f32; b_ref: (C,) SMEM f32
        x = x_ref[...].astype(jnp.float32)            # (C, T)
        for co in range(c):
            acc = w_ref[co, 0] * x[0:1, :]
            for ci in range(1, c):
                acc = acc + w_ref[co, ci] * x[ci:ci + 1, :]
            o_ref[co:co + 1, :] = (acc + b_ref[co]).astype(o_ref.dtype)

    return kernel


# ---------------------------------------------------------------------------
# Tiling / VMEM policy
# ---------------------------------------------------------------------------

def _vmem_budgets():
    """Return (tile_budget_bytes, vmem_limit_bytes) derived from the chip."""
    try:
        cap = pltpu.get_tpu_info().vmem_capacity_bytes
    except Exception:
        cap = 64 * 1024 * 1024                  # conservative fallback (v7x-sized)
    if cap >= 96 * 1024 * 1024:                 # v5e / v6e: 128 MiB physical VMEM
        return 40 * 1024 * 1024, 96 * 1024 * 1024
    return 20 * 1024 * 1024, 48 * 1024 * 1024   # v7x: 64 MiB physical VMEM


def _choose_hw_tile(hw, n, c, itemsize, tile_budget):
    """Largest lane-dense spatial tile under the VMEM budget, shrunk if needed so
    the (N, spatial-tiles) grid has enough programs to feed both v7x TensorCores
    (and megacore on v5e/v6e)."""
    sublane = 8 if itemsize >= 4 else 16
    c_pad = _cdiv(c, sublane) * sublane
    per_t_bytes = 4 * c_pad * itemsize          # in + out tile, double-buffered
    max_t = max(128, (tile_budget // per_t_bytes) // 128 * 128)
    t = hw if hw <= max_t else max_t            # full extent or multiple of 128

    MIN_PROGRAMS = 4                            # >= 2 per TensorCore on v7x
    if n * _cdiv(hw, t) < MIN_PROGRAMS and hw > 128:
        want_tiles = min(_cdiv(MIN_PROGRAMS, n), _cdiv(hw, 128))
        t = max(128, _cdiv(_cdiv(hw, want_tiles), 128) * 128)
    return t


# ---------------------------------------------------------------------------
# Forward wrapper
# ---------------------------------------------------------------------------

def drop_path_conv1x1_forward(x_nchw, weight, bias, *, drop_rate, training, coin):
    """DropPath(drop_rate, Conv2d(C, C, 1)).forward(x_nchw) on TPU.

    `coin` is the host-side uniform sample standing in for np.random.rand(); the
    Bernoulli decision happens outside the traced graph, exactly as in PyTorch.
    """
    if training and coin < drop_rate:
        return x_nchw                           # path dropped: `return feats`

    factor = 1.0 / (1.0 - drop_rate) if training else 1.0

    N, C, H, W = x_nchw.shape
    HW = H * W
    x_flat = x_nchw.reshape(N, C, HW)           # free view: no data movement

    # PyTorch Conv2d weight (C_out, C_in, 1, 1) -> (C_out, C_in); y = W @ x + b.
    w_mat = jnp.asarray(weight, jnp.float32).reshape(C, C)
    b_vec = jnp.asarray(bias, jnp.float32).reshape(C)

    if factor != 1.0:
        # Fold x + factor*(Wx + b - x) into the operands (in f32, cast only after):
        #   w_eff @ x + b_eff  ==  x + factor*(W @ x + b - x)
        w_eff = factor * w_mat + (1.0 - factor) * jnp.eye(C, dtype=jnp.float32)
        b_eff = factor * b_vec
    else:
        w_eff, b_eff = w_mat, b_vec             # eval mode: exact module output

    itemsize = jnp.dtype(x_flat.dtype).itemsize
    tile_budget, vmem_limit = _vmem_budgets()
    T = _choose_hw_tile(HW, N, C, itemsize, tile_budget)
    grid = (N, pl.cdiv(HW, T))

    sublane = 8 if itemsize >= 4 else 16
    use_vpu = C < sublane                       # tiny channel counts (e.g. C=4)

    if use_vpu:
        kernel = _make_conv1x1_vpu_kernel(C)
        w_in, b_in = w_eff, b_eff               # f32 scalars in SMEM
        w_spec = pl.BlockSpec(memory_space=pltpu.MemorySpace.SMEM)
        b_spec = pl.BlockSpec(memory_space=pltpu.MemorySpace.SMEM)
    else:
        kernel = _conv1x1_mxu_kernel
        w_in = w_eff.astype(x_flat.dtype)       # bf16 weights for bf16 models
        b_in = b_eff.reshape(C, 1)              # bias stays f32 (added to f32 acc)
        w_spec = pl.BlockSpec((C, C), lambda n, j: (0, 0))
        b_spec = pl.BlockSpec((C, 1), lambda n, j: (0, 0))

    # 3-deep input pipelining only if it does not compete with tile size for VMEM.
    c_pad = _cdiv(C, sublane) * sublane
    want_buffered = (3 + 2) * c_pad * T * itemsize <= tile_budget

    def run(buffered):
        x_kwargs = {"pipeline_mode": pl.Buffered(3)} if buffered else {}
        x_spec = pl.BlockSpec((pl.Squeezed(), C, T), lambda n, j: (n, 0, j), **x_kwargs)
        out_spec = pl.BlockSpec((pl.Squeezed(), C, T), lambda n, j: (n, 0, j))
        return pl.pallas_call(
            kernel,
            out_shape=jax.ShapeDtypeStruct((N, C, HW), x_flat.dtype),
            grid_spec=pltpu.PrefetchScalarGridSpec(
                num_scalar_prefetch=0,
                grid=grid,
                in_specs=[x_spec, w_spec, b_spec],
                out_specs=out_spec,
            ),
            compiler_params=pltpu.CompilerParams(
                dimension_semantics=("parallel", "parallel"),
                vmem_limit_bytes=vmem_limit,
            ),
        )(x_flat, w_in, b_in)

    if want_buffered:
        try:
            out_flat = run(True)
        except Exception:
            out_flat = run(False)               # default double-buffering fallback
    else:
        out_flat = run(False)

    return out_flat.reshape(N, C, H, W)         # free view back to NCHW


# ---------------------------------------------------------------------------
# Pure-JAX reference mirroring the PyTorch forward
# ---------------------------------------------------------------------------

def _reference(x_nchw, weight, bias, *, drop_rate, training, coin):
    if training and coin < drop_rate:
        return x_nchw
    N, C, H, W = x_nchw.shape
    xf = x_nchw.astype(jnp.float32)
    w_mat = jnp.asarray(weight, jnp.float32).reshape(C, C)
    y = jnp.einsum("nchw,oc->nohw", xf, w_mat) + jnp.asarray(bias, jnp.float32).reshape(1, C, 1, 1)
    factor = 1.0 / (1.0 - drop_rate) if training else 1.0
    if training and factor != 1.0:
        return xf + factor * (y - xf)
    return y


if __name__ == "__main__":
    key = jax.random.PRNGKey(0)
    kx, kw, kb, kx2, kw2, kb2 = jax.random.split(key, 6)

    np.random.seed(0)
    coin = float(np.random.rand())              # host-side np.random.rand() stand-in
    drop_rate = 0.2
    ok = True

    # Case 1: spec-sized input (N=2, C=4, 16x16), f32 -> small-channel VPU path.
    N, C, H, W = 2, 4, 16, 16
    x = jax.random.normal(kx, (N, C, H, W), dtype=jnp.float32)
    weight = 0.1 * jax.random.normal(kw, (C, C, 1, 1), dtype=jnp.float32)
    bias = 0.05 * jax.random.normal(kb, (C,), dtype=jnp.float32)

    for training in (False, True):
        out = drop_path_conv1x1_forward(x, weight, bias, drop_rate=drop_rate,
                                        training=training, coin=coin)
        out = jax.block_until_ready(out)
        ref = _reference(x, weight, bias, drop_rate=drop_rate,
                         training=training, coin=coin)
        ok = ok and bool(jnp.allclose(out, ref, atol=1e-5, rtol=1e-5))

    # Dropped-path branch (coin < drop_rate): identity.
    out_dropped = jax.block_until_ready(
        drop_path_conv1x1_forward(x, weight, bias, drop_rate=drop_rate,
                                  training=True, coin=0.0))
    ok = ok and bool(jnp.allclose(out_dropped, x))

    # Case 2: realistic width (C=32, N=1), bf16 activations -> MXU path,
    # megacore grid split, tail-masked spatial tiles, half the HBM traffic.
    N2, C2, H2, W2 = 1, 32, 24, 24
    x2 = jax.random.normal(kx2, (N2, C2, H2, W2), dtype=jnp.float32).astype(jnp.bfloat16)
    w2 = 0.1 * jax.random.normal(kw2, (C2, C2, 1, 1), dtype=jnp.float32)
    b2 = 0.05 * jax.random.normal(kb2, (C2,), dtype=jnp.float32)
    out2 = jax.block_until_ready(
        drop_path_conv1x1_forward(x2, w2, b2, drop_rate=drop_rate,
                                  training=True, coin=coin))
    ref2 = _reference(x2.astype(jnp.float32), w2, b2, drop_rate=drop_rate,
                      training=True, coin=coin)
    ok = ok and bool(jnp.allclose(out2.astype(jnp.float32), ref2, atol=5e-2, rtol=5e-2))

    print("KERNEL_OK" if ok else "MISMATCH")
</pallas_src>

<mosaic_0001>
module attributes {stable_mosaic.version = 11 : i64} {
  func.func @kernel(%arg0: i32, %arg1: i32, %arg2: memref<1x4x128xf32, #tpu.memory_space<vmem>>, %arg3: memref<4x4xf32, #tpu.memory_space<smem>>, %arg4: memref<4xf32, #tpu.memory_space<smem>>, %arg5: memref<1x4x128xf32, #tpu.memory_space<vmem>>) attributes {dimension_semantics = [#tpu.dimension_semantics<parallel>, #tpu.dimension_semantics<parallel>], iteration_bounds = array<i64: 2, 2>, scalar_prefetch = 0 : i64, scratch_operands = 0 : i64, tpu.core_type = #tpu.core_type<tc>, window_params = [{transform_indices = @transform_0, window_bounds = array<i64: 1, 4, 128>}, {transform_indices = @transform_1, window_bounds = array<i64: 4, 4>}, {transform_indices = @transform_2, window_bounds = array<i64: 4>}, {transform_indices = @transform_3, window_bounds = array<i64: 1, 4, 128>}]} {
    %c0 = arith.constant 0 : index
    %c0_0 = arith.constant 0 : index
    %c0_1 = arith.constant 0 : index
    %0 = vector.load %arg2[%c0, %c0_0, %c0_1] : memref<1x4x128xf32, #tpu.memory_space<vmem>>, vector<1x4x128xf32>
    %1 = vector.shape_cast %0 : vector<1x4x128xf32> to vector<4x128xf32>
    %c0_2 = arith.constant 0 : index
    %c0_3 = arith.constant 0 : index
    %2 = memref.load %arg3[%c0_2, %c0_3] : memref<4x4xf32, #tpu.memory_space<smem>>
    %3 = vector.extract_strided_slice %1 {offsets = [0, 0], sizes = [1, 128], strides = [1, 1]} : vector<4x128xf32> to vector<1x128xf32>
    %4 = vector.broadcast %2 : f32 to vector<1x128xf32>
    %5 = arith.mulf %4, %3 : vector<1x128xf32>
    %c0_4 = arith.constant 0 : index
    %c1 = arith.constant 1 : index
    %6 = memref.load %arg3[%c0_4, %c1] : memref<4x4xf32, #tpu.memory_space<smem>>
    %7 = vector.extract_strided_slice %1 {offsets = [1, 0], sizes = [1, 128], strides = [1, 1]} : vector<4x128xf32> to vector<1x128xf32>
    %8 = vector.broadcast %6 : f32 to vector<1x128xf32>
    %9 = arith.mulf %8, %7 : vector<1x128xf32>
    %10 = arith.addf %5, %9 : vector<1x128xf32>
    %c0_5 = arith.constant 0 : index
    %c2 = arith.constant 2 : index
    %11 = memref.load %arg3[%c0_5, %c2] : memref<4x4xf32, #tpu.memory_space<smem>>
    %12 = vector.extract_strided_slice %1 {offsets = [2, 0], sizes = [1, 128], strides = [1, 1]} : vector<4x128xf32> to vector<1x128xf32>
    %13 = vector.broadcast %11 : f32 to vector<1x128xf32>
    %14 = arith.mulf %13, %12 : vector<1x128xf32>
    %15 = arith.addf %10, %14 : vector<1x128xf32>
    %c0_6 = arith.constant 0 : index
    %c3 = arith.constant 3 : index
    %16 = memref.load %arg3[%c0_6, %c3] : memref<4x4xf32, #tpu.memory_space<smem>>
    %17 = vector.extract_strided_slice %1 {offsets = [3, 0], sizes = [1, 128], strides = [1, 1]} : vector<4x128xf32> to vector<1x128xf32>
    %18 = vector.broadcast %16 : f32 to vector<1x128xf32>
    %19 = arith.mulf %18, %17 : vector<1x128xf32>
    %20 = arith.addf %15, %19 : vector<1x128xf32>
    %c0_7 = arith.constant 0 : index
    %21 = memref.load %arg4[%c0_7] : memref<4xf32, #tpu.memory_space<smem>>
    %22 = vector.broadcast %21 : f32 to vector<1x128xf32>
    %23 = arith.addf %20, %22 : vector<1x128xf32>
    %c0_8 = arith.constant 0 : index
    %c0_9 = arith.constant 0 : index
    %c0_10 = arith.constant 0 : index
    %24 = vector.load %arg5[%c0_8, %c0_9, %c0_10] : memref<1x4x128xf32, #tpu.memory_space<vmem>>, vector<1x1x128xf32>
    %25 = vector.shape_cast %24 : vector<1x1x128xf32> to vector<1x128xf32>
    %26 = vector.shape_cast %23 : vector<1x128xf32> to vector<1x1x128xf32>
    tpu.vector_store %arg5[%c0_8, %c0_9, %c0_10], %26 {strides = array<i32>} : memref<1x4x128xf32, #tpu.memory_space<vmem>>, vector<1x1x128xf32>,
    %c1_11 = arith.constant 1 : index
    %c0_12 = arith.constant 0 : index
    %27 = memref.load %arg3[%c1_11, %c0_12] : memref<4x4xf32, #tpu.memory_space<smem>>
    %28 = vector.extract_strided_slice %1 {offsets = [0, 0], sizes = [1, 128], strides = [1, 1]} : vector<4x128xf32> to vector<1x128xf32>
    %29 = vector.broadcast %27 : f32 to vector<1x128xf32>
    %30 = arith.mulf %29, %28 : vector<1x128xf32>
    %c1_13 = arith.constant 1 : index
    %c1_14 = arith.constant 1 : index
    %31 = memref.load %arg3[%c1_13, %c1_14] : memref<4x4xf32, #tpu.memory_space<smem>>
    %32 = vector.extract_strided_slice %1 {offsets = [1, 0], sizes = [1, 128], strides = [1, 1]} : vector<4x128xf32> to vector<1x128xf32>
    %33 = vector.broadcast %31 : f32 to vector<1x128xf32>
    %34 = arith.mulf %33, %32 : vector<1x128xf32>
    %35 = arith.addf %30, %34 : vector<1x128xf32>
    %c1_15 = arith.constant 1 : index
    %c2_16 = arith.constant 2 : index
    %36 = memref.load %arg3[%c1_15, %c2_16] : memref<4x4xf32, #tpu.memory_space<smem>>
    %37 = vector.extract_strided_slice %1 {offsets = [2, 0], sizes = [1, 128], strides = [1, 1]} : vector<4x128xf32> to vector<1x128xf32>
    %38 = vector.broadcast %36 : f32 to vector<1x128xf32>
    %39 = arith.mulf %38, %37 : vector<1x128xf32>
    %40 = arith.addf %35, %39 : vector<1x128xf32>
    %c1_17 = arith.constant 1 : index
    %c3_18 = arith.constant 3 : index
    %41 = memref.load %arg3[%c1_17, %c3_18] : memref<4x4xf32, #tpu.memory_space<smem>>
    %42 = vector.extract_strided_slice %1 {offsets = [3, 0], sizes = [1, 128], strides = [1, 1]} : vector<4x128xf32> to vector<1x128xf32>
    %43 = vector.broadcast %41 : f32 to vector<1x128xf32>
    %44 = arith.mulf %43, %42 : vector<1x128xf32>
    %45 = arith.addf %40, %44 : vector<1x128xf32>
    %c1_19 = arith.constant 1 : index
    %46 = memref.load %arg4[%c1_19] : memref<4xf32, #tpu.memory_space<smem>>
    %47 = vector.broadcast %46 : f32 to vector<1x128xf32>
    %48 = arith.addf %45, %47 : vector<1x128xf32>
    %c0_20 = arith.constant 0 : index
    %c1_21 = arith.constant 1 : index
    %c0_22 = arith.constant 0 : index
    %49 = vector.load %arg5[%c0_20, %c1_21, %c0_22] : memref<1x4x128xf32, #tpu.memory_space<vmem>>, vector<1x1x128xf32>
    %50 = vector.shape_cast %49 : vector<1x1x128xf32> to vector<1x128xf32>
    %51 = vector.shape_cast %48 : vector<1x128xf32> to vector<1x1x128xf32>
    tpu.vector_store %arg5[%c0_20, %c1_21, %c0_22], %51 {strides = array<i32>} : memref<1x4x128xf32, #tpu.memory_space<vmem>>, vector<1x1x128xf32>,
    %c2_23 = arith.constant 2 : index
    %c0_24 = arith.constant 0 : index
    %52 = memref.load %arg3[%c2_23, %c0_24] : memref<4x4xf32, #tpu.memory_space<smem>>
    %53 = vector.extract_strided_slice %1 {offsets = [0, 0], sizes = [1, 128], strides = [1, 1]} : vector<4x128xf32> to vector<1x128xf32>
    %54 = vector.broadcast %52 : f32 to vector<1x128xf32>
    %55 = arith.mulf %54, %53 : vector<1x128xf32>
    %c2_25 = arith.constant 2 : index
    %c1_26 = arith.constant 1 : index
    %56 = memref.load %arg3[%c2_25, %c1_26] : memref<4x4xf32, #tpu.memory_space<smem>>
    %57 = vector.extract_strided_slice %1 {offsets = [1, 0], sizes = [1, 128], strides = [1, 1]} : vector<4x128xf32> to vector<1x128xf32>
    %58 = vector.broadcast %56 : f32 to vector<1x128xf32>
    %59 = arith.mulf %58, %57 : vector<1x128xf32>
    %60 = arith.addf %55, %59 : vector<1x128xf32>
    %c2_27 = arith.constant 2 : index
    %c2_28 = arith.constant 2 : index
    %61 = memref.load %arg3[%c2_27, %c2_28] : memref<4x4xf32, #tpu.memory_space<smem>>
    %62 = vector.extract_strided_slice %1 {offsets = [2, 0], sizes = [1, 128], strides = [1, 1]} : vector<4x128xf32> to vector<1x128xf32>
    %63 = vector.broadcast %61 : f32 to vector<1x128xf32>
    %64 = arith.mulf %63, %62 : vector<1x128xf32>
    %65 = arith.addf %60, %64 : vector<1x128xf32>
    %c2_29 = arith.constant 2 : index
    %c3_30 = arith.constant 3 : index
    %66 = memref.load %arg3[%c2_29, %c3_30] : memref<4x4xf32, #tpu.memory_space<smem>>
    %67 = vector.extract_strided_slice %1 {offsets = [3, 0], sizes = [1, 128], strides = [1, 1]} : vector<4x128xf32> to vector<1x128xf32>
    %68 = vector.broadcast %66 : f32 to vector<1x128xf32>
    %69 = arith.mulf %68, %67 : vector<1x128xf32>
    %70 = arith.addf %65, %69 : vector<1x128xf32>
    %c2_31 = arith.constant 2 : index
    %71 = memref.load %arg4[%c2_31] : memref<4xf32, #tpu.memory_space<smem>>
    %72 = vector.broadcast %71 : f32 to vector<1x128xf32>
    %73 = arith.addf %70, %72 : vector<1x128xf32>
    %c0_32 = arith.constant 0 : index
    %c2_33 = arith.constant 2 : index
    %c0_34 = arith.constant 0 : index
    %74 = vector.load %arg5[%c0_32, %c2_33, %c0_34] : memref<1x4x128xf32, #tpu.memory_space<vmem>>, vector<1x1x128xf32>
    %75 = vector.shape_cast %74 : vector<1x1x128xf32> to vector<1x128xf32>
    %76 = vector.shape_cast %73 : vector<1x128xf32> to vector<1x1x128xf32>
    tpu.vector_store %arg5[%c0_32, %c2_33, %c0_34], %76 {strides = array<i32>} : memref<1x4x128xf32, #tpu.memory_space<vmem>>, vector<1x1x128xf32>,
    %c3_35 = arith.constant 3 : index
    %c0_36 = arith.constant 0 : index
    %77 = memref.load %arg3[%c3_35, %c0_36] : memref<4x4xf32, #tpu.memory_space<smem>>
    %78 = vector.extract_strided_slice %1 {offsets = [0, 0], sizes = [1, 128], strides = [1, 1]} : vector<4x128xf32> to vector<1x128xf32>
    %79 = vector.broadcast %77 : f32 to vector<1x128xf32>
    %80 = arith.mulf %79, %78 : vector<1x128xf32>
    %c3_37 = arith.constant 3 : index
    %c1_38 = arith.constant 1 : index
    %81 = memref.load %arg3[%c3_37, %c1_38] : memref<4x4xf32, #tpu.memory_space<smem>>
    %82 = vector.extract_strided_slice %1 {offsets = [1, 0], sizes = [1, 128], strides = [1, 1]} : vector<4x128xf32> to vector<1x128xf32>
    %83 = vector.broadcast %81 : f32 to vector<1x128xf32>
    %84 = arith.mulf %83, %82 : vector<1x128xf32>
    %85 = arith.addf %80, %84 : vector<1x128xf32>
    %c3_39 = arith.constant 3 : index
    %c2_40 = arith.constant 2 : index
    %86 = memref.load %arg3[%c3_39, %c2_40] : memref<4x4xf32, #tpu.memory_space<smem>>
    %87 = vector.extract_strided_slice %1 {offsets = [2, 0], sizes = [1, 128], strides = [1, 1]} : vector<4x128xf32> to vector<1x128xf32>
    %88 = vector.broadcast %86 : f32 to vector<1x128xf32>
    %89 = arith.mulf %88, %87 : vector<1x128xf32>
    %90 = arith.addf %85, %89 : vector<1x128xf32>
    %c3_41 = arith.constant 3 : index
    %c3_42 = arith.constant 3 : index
    %91 = memref.load %arg3[%c3_41, %c3_42] : memref<4x4xf32, #tpu.memory_space<smem>>
    %92 = vector.extract_strided_slice %1 {offsets = [3, 0], sizes = [1, 128], strides = [1, 1]} : vector<4x128xf32> to vector<1x128xf32>
    %93 = vector.broadcast %91 : f32 to vector<1x128xf32>
    %94 = arith.mulf %93, %92 : vector<1x128xf32>
    %95 = arith.addf %90, %94 : vector<1x128xf32>
    %c3_43 = arith.constant 3 : index
    %96 = memref.load %arg4[%c3_43] : memref<4xf32, #tpu.memory_space<smem>>
    %97 = vector.broadcast %96 : f32 to vector<1x128xf32>
    %98 = arith.addf %95, %97 : vector<1x128xf32>
    %c0_44 = arith.constant 0 : index
    %c3_45 = arith.constant 3 : index
    %c0_46 = arith.constant 0 : index
    %99 = vector.load %arg5[%c0_44, %c3_45, %c0_46] : memref<1x4x128xf32, #tpu.memory_space<vmem>>, vector<1x1x128xf32>
    %100 = vector.shape_cast %99 : vector<1x1x128xf32> to vector<1x128xf32>
    %101 = vector.shape_cast %98 : vector<1x128xf32> to vector<1x1x128xf32>
    tpu.vector_store %arg5[%c0_44, %c3_45, %c0_46], %101 {strides = array<i32>} : memref<1x4x128xf32, #tpu.memory_space<vmem>>, vector<1x1x128xf32>,
    return
  }
  func.func @transform_0(%arg0: i32, %arg1: i32) -> (i32, i32, i32) {
    %c0_i32 = arith.constant 0 : i32
    %c0_i32_0 = arith.constant 0 : i32
    return %arg0, %c0_i32, %arg1 : i32, i32, i32
  }
  func.func @transform_1(%arg0: i32, %arg1: i32) -> (i32, i32) {
    %c0_i32 = arith.constant 0 : i32
    %c0_i32_0 = arith.constant 0 : i32
    %c0_i32_1 = arith.constant 0 : i32
    return %c0_i32, %c0_i32_0 : i32, i32
  }
  func.func @transform_2(%arg0: i32, %arg1: i32) -> i32 {
    %c0_i32 = arith.constant 0 : i32
    %c0_i32_0 = arith.constant 0 : i32
    return %c0_i32 : i32
  }
  func.func @transform_3(%arg0: i32, %arg1: i32) -> (i32, i32, i32) {
    %c0_i32 = arith.constant 0 : i32
    %c0_i32_0 = arith.constant 0 : i32
    return %arg0, %c0_i32, %arg1 : i32, i32, i32
  }
}

</mosaic_0001>

<bundles_post_ra>
// kernel: tpu_custom_call.1
= control target key start
LH: loop header
LB: loop body
LE: loop exit
PB: predicated region body
PF: predicated region fallthrough
CT: control target
= control target key end

     0   :  { %s1099_s0 = inlined_call_operand.hbm [shape: f32[2,4,256], index: 0, kind: input, shape index: {}]   ;;  %s1100_s1 = inlined_call_operand.hbm [shape: f32[4,4], index: 1, kind: input, shape index: {}]   ;;  %s1101_s2 = inlined_call_operand.vmem [shape: f32[4], index: 2, kind: input, shape index: {}]   ;;  %s1102_s3 = inlined_call_operand.hbm [shape: f32[2,4,256], index: 3, kind: output, shape index: {}]  }
   0x1   :  { %1109 = sst [smem:[#allocation16_spill]] %s1100_s1 }
   0x2   :  { %1110 = sst [smem:[#allocation17_spill]] %s1101_s2 }
   0x3   :  { %8 = vsyncpa [#allocation3], 0 }
   0x4   :  { %10 = vsyncpa [#allocation3 + $0x1], 0 }
   0x5   :  { %11 = vsyncpa [#allocation5], 0 }
   0x6   :  { %12 = vsyncpa [#allocation6], 0 }
   0x7   :  { %13 = vsyncpa [#allocation4], 0 }
   0x8   :  { %15 = vsyncpa [#allocation4 + $0x1], 0  ;;  %s793_s12 = smov 0   ;;  %s795_s13 = smov 0  }
   0x9   :  { %s797_s14 = smov 0   ;;  %s799_s15 = smov 0  }
   0xa   :  { %s801_s16 = smov 0   ;;  %s803_s17 = smov 0  }
   0xb   :  { %s805_s18 = smov 0   ;;  %s807_s19 = smov 0  }
   0xc LB: > { %s467_s20 = sadd.s32 4294967295, %s767_s19   ;;  %s468_s21 = sadd.s32 4294967294, %s767_s19   ;;  %s767_s19 = sphi %s807_s19, %s21_s19   ;;  %s763_s18 = sphi %s805_s18, %s1135_s18   ;;  %s759_s17 = sphi %s803_s17, %s1134_s17   ;;  %s755_s16 = sphi %s801_s16, %s1133_s16   ;;  %s751_s15 = sphi %s799_s15, %s1132_s15   ;;  %s747_s14 = sphi %s797_s14, %s1131_s14   ;;  %s743_s13 = sphi %s795_s13, %s1130_s13   ;;  %s739_s12 = sphi %s793_s12, %s1129_s12  }
   0xd   : > { %p55_p0 = scmp.ne.s32.totalorder %s743_s13, %s739_s12  ;;  %p839_p1 = scmp.eq.s32.totalorder %s467_s20, 0 }
   0xe   : > { %p129_p2 = scmp.eq.s32.totalorder %s468_s21, 3  ;;  %p469_p4 = scmp.ge.s32.totalorder %s767_s19, 1 }
   0xf   : > { %s1111_s22 = scalar_select %p839_p1, 1, 0 }
  0x10   : > { %p845_p3 = por %p839_p1, %p55_p0  ;;  %p850_p5 = por %p129_p2, %p55_p0 }
  0x11   : > { %p136_p6 = scmp.lt.s32.totalorder %s767_s19, 5  ;;  %s1116_s2 = sld [smem:[#allocation17_spill]] }
  0x12   : > { %s1112_s23 = scalar_select %p845_p3, 1, 0 }
  0x13   : > { %s1113_s24 = scalar_select %p850_p5, 1, 0 }
  0x14   : > { %p855_p7 = pnand %p469_p4, %p136_p6  ;;  %s1118_s1 = sld [smem:[#allocation16_spill]] }
  0x15   : > { %1114 = sst [smem:[#allocation14_spill]] %s1113_s24 }
  0x16   : > { %p516_p8 = pneg %p855_p7 }
  0x17   : > { %s158_s28 = sshll.u32 %s1116_s2, 4  ;;  %s159_s28 = int_to_ptr.vmem [resolvable:$true] %s158_s28 }
  0x18   : > { %p866_p9 = pnand %p516_p8, %p839_p1 }
  0x1a   : > { %s603_s5 = scalar_lea.hbm %s1118_s1, 64  ;;  %p605_p11 = pneg %p866_p9 }
  0x1b   : > { %p604_p10 = scmp.ne.s32.totalorder %s1118_s1, %s603_s5  ;;  %p610_p0 = scmp.lt.u32.totalorder %s603_s5, %s1118_s1 }
  0x1d   : > { %p606_p12 = pnand %p605_p11, %p604_p10 }
  0x1f   : > { %p607_p13 = pneg %p606_p12 }
  0x21   : > { %p612_p2 = pnand %p610_p0, %p607_p13 }
  0x23   : > { %615 = shalt.err (!%p612_p2)
}
  0x24   : > { %s769_s10 = smov [#allocation7]   ;;  %s616_s26 = scalar_lea.vmem %s159_s28, 16 }
  0x25   : > { %519 = dma.hbm_to_smem (!%p866_p9), %s1118_s1, 64, %s769_s10, [#allocation5]  }
  0x26   : > { %p617_p4 = scmp.ne.s32.totalorder %s159_s28, %s616_s26  ;;  %p624_p5 = scmp.lt.s32.totalorder %s159_s28, %s159_s28 }
  0x27   : > { %p625_p10 = scmp.lt.s32.totalorder %s616_s26, %s616_s26 }
  0x28   : > { %p619_p6 = pnand %p617_p4, %p605_p11 }
  0x29   : > { %p626_p12 = por %p625_p10, %p624_p5 }
  0x2a   : > { %p620_p8 = pneg %p619_p6 }
  0x2c   : > { %p627_p1 = pnand %p626_p12, %p620_p8 }
  0x2e   : > { %630 = shalt.err (!%p627_p1)
}
  0x2f   : > { %s770_s27 = smov [#allocation8]   ;;  %p123_p11 = scmp.eq.s32.totalorder %s467_s20, 3 }
  0x30   : > { %522 = dma.vmem_to_smem (!%p866_p9), %s159_s28, 16, %s770_s27, [#allocation6]  }
  0x31   : > { %s30_s30 = sadd.s32 1, %s759_s17  ;;  %s33_s4 = sadd.s32 1, %s763_s18 }
  0x32   : > { %p31_p1 = scmp.ge.s32.totalorder %s30_s30, 2  ;;  %p49_p5 = scmp.ne.s32.totalorder %s747_s14, %s743_s13 }
  0x33   : > { %p50_p13 = scmp.eq.s32.totalorder %s767_s19, 0  ;;  %s42_s5 = sadd.s32 1, %s747_s14 }
  0x34   : > { %s1137_s30 = smov (%p31_p1, %s30_s30), 0  ;;  %s1139_s4 = smov (!%p31_p1, %s33_s4), %s763_s18 }
  0x35   : > { %1119 = sst [smem:[#allocation15_spill]] %s1137_s30  ;;  %s38_s29 = ssub.s32 %s759_s17, %s1137_s30 }
  0x36   : > { %p35_p0 = scmp.ge.s32.totalorder %s1139_s4, 2  ;;  %p901_p9 = por %p123_p11, %p49_p5 }
  0x37   : > { %p905_p2 = por %p50_p13, %p49_p5  ;;  %s169_s6 = sand.u32 1, %s747_s14  }
  0x38   : > { %s1120_s28 = scalar_select %p901_p9, 1, 0 }
  0x39   : > { %s1141_s4 = smov (%p35_p0, %s1139_s4), 0  ;;  %p533_p4 = scmp.lt.s32.totalorder %s767_s19, 4 }
  0x3a   : > { %s473_s7 = sshll.u32 %s169_s6, 2  ;;  %s37_s8 = ssub.s32 %s763_s18, %s1141_s4 }
  0x3b   : > { %s39_s9 = sor.u32 %s38_s29, %s37_s8  ;;  %s474_s10 = sshll.u32 %s763_s18, 1 }
  0x3c   : > { %p40_p6 = scmp.eq.s32.totalorder %s39_s9, 0  ;;  %s178_s11 = sadd.s32 %s759_s17, %s474_s10 }
  0x3d   : > { %s475_s21 = sshll.u32 %s178_s11, 6  ;;  %s173_s26 = scalar_lea.vmem [#allocation2], %s473_s7 }
  0x3e   : > { %s182_s27 = sshll.u32 %s173_s26, 4  ;;  %s923_s24 = scalar_lea.hbm %s1099_s0, %s475_s21  ;;  %s925_s27 = int_to_ptr.vmem [resolvable:$true] %s182_s27 }
  0x3f   : > { %s918_s1 = scalar_select %p40_p6, %s747_s14, %s42_s5  }
  0x40   : > { %p931_p8 = pnand %p533_p4, %p905_p2  ;;  %s170_s5 = scalar_lea.sflag [#allocation3], %s169_s6 }
  0x41   : > { %s631_s7 = scalar_lea.hbm %s923_s24, 64  ;;  %s636_s20 = scalar_lea.hbm %s1099_s0, 256 }
  0x42   : > { %p632_p10 = scmp.ne.s32.totalorder %s923_s24, %s631_s7  ;;  %p633_p12 = pneg %p931_p8 }
  0x43   : > { %p637_p5 = scmp.lt.u32.totalorder %s923_s24, %s1099_s0  ;;  %p638_p13 = scmp.lt.u32.totalorder %s636_s20, %s631_s7 }
  0x44   : > { %p634_p11 = pnand %p633_p12, %p632_p10  ;;  %p640_p2 = scmp.lt.u32.totalorder %s631_s7, %s923_s24 }
  0x45   : > { %p639_p0 = por %p638_p13, %p637_p5 }
  0x46   : > { %p635_p1 = pneg %p634_p11 }
  0x47   : > { %p641_p4 = por %p640_p2, %p639_p0 }
  0x49   : > { %p642_p6 = pnand %p641_p4, %p635_p1 }
  0x4b   : > { %645 = shalt.err (!%p642_p6)
}
  0x4c   : > { %s646_s6 = scalar_lea.vmem %s925_s27, 64  ;;  %s771_s10 = smov [#allocation2]  }
  0x4d   : > { %p647_p10 = scmp.ne.s32.totalorder %s925_s27, %s646_s6  ;;  %s651_s11 = sshll.u32 %s771_s10, 4  ;;  %s652_s11 = int_to_ptr.vmem [resolvable:$false] %s651_s11 }
  0x4e   : > { %s653_s21 = scalar_lea.vmem %s652_s11, 128  ;;  %p654_p3 = scmp.lt.s32.totalorder %s925_s27, %s652_s11 }
  0x4f   : > { %p649_p11 = pnand %p647_p10, %p633_p12  ;;  %p655_p5 = scmp.lt.s32.totalorder %s653_s21, %s646_s6 }
  0x51   : > { %p650_p9 = pneg %p649_p11  ;;  %p656_p13 = por %p655_p5, %p654_p3 }
  0x53   : > { %p657_p0 = pnand %p656_p13, %p650_p9 }
  0x55   : > { %660 = shalt.err (!%p657_p0)
}
  0x56   : > { %526 = dma.hbm_to_vmem [thread:$0]  (!%p931_p8), %s923_s24, 64, %s925_s27, %s170_s5  }
  0x57   : > { %191 = sbr.rel (%p855_p7) target bundleno = 146 (0x92), region = 32  ;;  %s963_s26 = sand.u32 (!%p855_p7), 1, %s743_s13  }
  0x58   : > { %s477_s7 = sshll.u32 (!%p855_p7), %s963_s26, 2  ;;  %s194_s2 = scalar_lea.sflag (!%p855_p7), [#allocation3], %s963_s26 }
  0x59   : > { %s197_s30 = scalar_lea.vmem (!%p855_p7), [#allocation2], %s477_s7  ;;  %p1123_p3 = scmp.ne.s32.totalorder (!%p855_p7), %s1112_s23, 0 }
  0x5e   : > { %722 = dma.done.wait (%p1123_p3), %s194_s2, 64  }
  0x5f   : > { %724 = vsyncadd (%p1123_p3), %s194_s2, 4294967232  ;;  %p1124_p9 = scmp.ne.s32.totalorder %s1111_s22, 0 }
  0x61   : > { %726 = dma.done.wait (%p1124_p9), [#allocation5], 64  }
  0x62   : > { %728 = vsyncadd (%p1124_p9), [#allocation5], 4294967232 }
  0x63   : > { %730 = dma.done.wait (%p1124_p9), [#allocation6], 16  }
  0x64   : > { %732 = vsyncadd (%p1124_p9), [#allocation6], 4294967280 }
  0x65   : > { %210 = sfence }
  0x66   : > { %s230_s24 = sld [smem:[#allocation7]]  ;;  %s481_s25 = sld [smem:[#allocation7 + $0x1]]  ;;  %v987_v0 = vld [vmem:[%s197_s30] sm:$0xf] }
  0x67   : > { %s482_s27 = sld [smem:[#allocation7 + $0x2]]  ;;  %s483_s29 = sld [smem:[#allocation7 + $0x3]] }
  0x68   : > { %s981_s5 = sld [smem:[#allocation8]]  ;;  %s485_s20 = sld [smem:[#allocation7 + $0x81]] }
  0x69   : > { %s484_s23 = sld [smem:[#allocation7 + $0x80]]  ;;  %s983_s8 = sld [smem:[#allocation7 + $0x82]] }
  0x6a   : > { %s985_s9 = sld [smem:[#allocation7 + $0x83]]  ;;  %s989_s6 = sld [smem:[#allocation7 + $0x100]] }
  0x6b   : > { %s991_s22 = sld [smem:[#allocation7 + $0x101]]  ;;  %s993_s10 = sld [smem:[#allocation7 + $0x102]] }
  0x6c   : > { %v231_v1 = vstv %s230_s24  ;;  %v234_v2 = vstv %s481_s25  ;;  %s995_s11 = sld [smem:[#allocation7 + $0x103]]  ;;  %s1000_s21 = sld [smem:[#allocation8 + $0x1]] }
  0x6d   : > { %v241_v3 = vstv %s482_s27  ;;  %v232_v4 = vmul.f32 %v231_v1, %v987_v0  ;;  %v235_v5 = vmul.f32 %v234_v2, %v987_v0  ;;  %v248_v7 = vstv %s483_s29  ;;  %s1002_s2 = sld [smem:[#allocation7 + $0x180]]  ;;  %s1007_s30 = sld [smem:[#allocation7 + $0x181]] }
  0x6e   : > { %v242_v6 = vmul.f32 %v241_v3, %v987_v0  ;;  %v249_v8 = vmul.f32 %v248_v7, %v987_v0  ;;  %v262_v10 = vstv %s485_s20  ;;  %s1009_s24 = sld [smem:[#allocation7 + $0x182]]  ;;  %v255_v16 = vstv %s981_s5  ;;  %s1014_s25 = sld [smem:[#allocation7 + $0x183]] }
  0x6f   : > { %v259_v9 = vstv %s484_s23  ;;  %v237_v11 = vrot.slane %v235_v5, 1  ;;  %v263_v14 = vmul.f32 %v262_v10, %v987_v0  ;;  %v269_v17 = vstv %s983_s8  ;;  %s1022_s27 = sld [smem:[#allocation8 + $0x2]]  ;;  %s498_s29 = sld [smem:[#allocation8 + $0x3]] }
  0x70   : > { %v244_v12 = vrot.slane %v242_v6, 2  ;;  %v260_v13 = vmul.f32 %v259_v9, %v987_v0  ;;  %v251_v15 = vrot.slane %v249_v8, 3  ;;  %v276_v18 = vstv %s985_s9  ;;  %s228_s5 = scalar_lea.vmem [#allocation9], %s477_s7  ;;  %s500_s23 = sshll.u32 %s755_s16, 1 }
  0x71   : > { %v239_v19 = vadd.f32 %v237_v11, %v232_v4  ;;  %v265_v20 = vrot.slane %v263_v14, 1  ;;  %v270_v21 = vmul.f32 %v269_v17, %v987_v0  ;;  %v277_v22 = vmul.f32 %v276_v18, %v987_v0  ;;  %s354_s20 = sadd.s32 %s751_s15, %s500_s23  ;;  %s358_s8 = sshll.u32 %s228_s5, 4  ;;  %s1047_s8 = int_to_ptr.vmem [resolvable:$true] %s358_s8 }
  0x72   : > { %v287_v23 = vstv %s989_s6  ;;  %v290_v24 = vstv %s991_s22  ;;  %v297_v25 = vstv %s993_s10  ;;  %v304_v26 = vstv %s995_s11  ;;  %s501_s7 = sshll.u32 %s354_s20, 6  ;;  %s343_s15 = scalar_lea.sflag [#allocation4], %s963_s26 }
  0x73   : > { %v246_v27 = vadd.f32 %v244_v12, %v239_v19  ;;  %v267_v28 = vadd.f32 %v265_v20, %v260_v13  ;;  %v272_v29 = vrot.slane %v270_v21, 2  ;;  %v279_v30 = vrot.slane %v277_v22, 3  ;;  %s1045_s6 = scalar_lea.hbm %s1102_s3, %s501_s7  ;;  %s661_s22 = scalar_lea.vmem %s1047_s8, 64 }
  0x74   : > { %v288_v31 = vmul.f32 %v287_v23, %v987_v0  ;;  %v291_v32 = vmul.f32 %v290_v24, %v987_v0  ;;  %v298_v33 = vmul.f32 %v297_v25, %v987_v0  ;;  %v305_v34 = vmul.f32 %v304_v26, %v987_v0  ;;  %p662_p7 = scmp.ne.s32.totalorder %s1047_s8, %s661_s22  ;;  %p1125_p8 = scmp.ne.s32.totalorder %s1120_s28, 0 }
  0x75   : > { %v253_v35 = vadd.f32 %v251_v15, %v246_v27  ;;  %v274_v36 = vadd.f32 %v272_v29, %v267_v28  ;;  %v283_v37 = vstv %s1000_s21  ;;  %v315_v38 = vstv %s1002_s2  ;;  %s772_s10 = smov [#allocation9]  }
  0x76   : > { %v293_v39 = vrot.slane %v291_v32, 1  ;;  %v300_v40 = vrot.slane %v298_v33, 2  ;;  %v307_v41 = vrot.slane %v305_v34, 3  ;;  %v316_v42 = vmul.f32 %v315_v38, %v987_v0  ;;  %p663_p12 = pnand %p662_p7, %p1125_p8  ;;  %s665_s11 = sshll.u32 %s772_s10, 4  ;;  %s666_s11 = int_to_ptr.vmem [resolvable:$false] %s665_s11 }
  0x77   : > { %v256_v43 = vadd.f32 %v255_v16, %v253_v35  ;;  %v281_v44 = vadd.f32 %v279_v30, %v274_v36  ;;  %v318_v45 = vstv %s1007_s30  ;;  %v325_v46 = vstv %s1009_s24  ;;  %s667_s21 = scalar_lea.vmem %s666_s11, 128  ;;  %p668_p2 = scmp.lt.s32.totalorder %s1047_s8, %s666_s11 }
  0x78   : > { %v295_v47 = vadd.f32 %v293_v39, %v288_v31  ;;  %v319_v48 = vmul.f32 %v318_v45, %v987_v0  ;;  %v326_v49 = vmul.f32 %v325_v46, %v987_v0  ;;  %v332_v50 = vstv %s1014_s25  ;;  %p664_p1 = pneg %p663_p12  ;;  %p669_p4 = scmp.lt.s32.totalorder %s667_s21, %s661_s22 }
  0x79   : > { %257 = vst [vmem:[%s228_s5] sm:$0x1] %v256_v43  ;;  %v284_v51 = vadd.f32 %v283_v37, %v281_v44  ;;  %v333_v52 = vmul.f32 %v332_v50, %v987_v0  ;;  %v311_v56 = vstv %s1022_s27  ;;  %v339_v62 = vstv %s498_s29 }
  0x7a   : > { %v302_v53 = vadd.f32 %v300_v40, %v295_v47  ;;  %v321_v54 = vrot.slane %v319_v48, 1  ;;  %v328_v55 = vrot.slane %v326_v49, 2  ;;  %p670_p6 = por %p669_p4, %p668_p2 }
  0x7b   : > { %285 = vst [vmem:[%s228_s5 + $0x1] sm:$0x1] %v284_v51  ;;  %v335_v59 = vrot.slane %v333_v52, 3 }
  0x7c   : > { %v309_v57 = vadd.f32 %v307_v41, %v302_v53  ;;  %v323_v58 = vadd.f32 %v321_v54, %v316_v42  ;;  %p671_p10 = pnand %p670_p6, %p664_p1 }
  0x7e   : > { %v312_v60 = vadd.f32 %v311_v56, %v309_v57  ;;  %v330_v61 = vadd.f32 %v328_v55, %v323_v58 }
  0x80   : > { %313 = vst [vmem:[%s228_s5 + $0x2] sm:$0x1] %v312_v60  ;;  %v337_v63 = vadd.f32 %v335_v59, %v330_v61 }
  0x82   : > { %v340_v0 = vadd.f32 %v339_v62, %v337_v63 }
  0x84   : > { %341 = vst [vmem:[%s228_s5 + $0x3] sm:$0x1] %v340_v0 }
  0x85   : > { %674 = shalt.err (!%p671_p10)
}
  0x86   : > { %s675_s26 = scalar_lea.hbm %s1045_s6, 64  ;;  %s679_s24 = scalar_lea.hbm %s1102_s3, 256 }
  0x87   : > { %p676_p11 = scmp.ne.s32.totalorder %s1045_s6, %s675_s26  ;;  %p680_p0 = scmp.lt.u32.totalorder %s1045_s6, %s1102_s3 }
  0x88   : > { %p681_p3 = scmp.lt.u32.totalorder %s679_s24, %s675_s26  ;;  %p683_p7 = scmp.lt.u32.totalorder %s675_s26, %s1045_s6 }
  0x89   : > { %p677_p5 = pnand %p676_p11, %p1125_p8 }
  0x8a   : > { %p682_p9 = por %p681_p3, %p680_p0 }
  0x8b   : > { %p678_p13 = pneg %p677_p5 }
  0x8c   : > { %p684_p12 = por %p683_p7, %p682_p9 }
  0x8e   : > { %p685_p1 = pnand %p684_p12, %p678_p13 }
  0x90   : > { %688 = shalt.err (!%p685_p1)
}
  0x91   : > { %514 = dma.vmem_to_hbm [thread:$0]  (%p1125_p8), %s1047_s8, 64, %s1045_s6, %s343_s15  }
  0x92 PF: > { %s1126_s29 = sld [smem:[#allocation14_spill]]  ;;  %p536_p2 = scmp.ge.s32.totalorder %s767_s19, 2 }
  0x93   : > { %s370_s5 = sand.u32 1, %s739_s12  }
  0x94   : > { %s371_s23 = scalar_lea.sflag [#allocation4], %s370_s5 }
  0x98   : > { %p1127_p4 = scmp.ne.s32.totalorder %s1126_s29, 0 }
  0x9a   : > { %p528_p6 = pnand %p536_p2, %p1127_p4 }
  0x9c   : > { %734 = dma.done.wait (!%p528_p6), %s371_s23, 64  }
  0x9d   : > { %736 = vsyncadd (!%p528_p6), %s371_s23, 4294967232  ;;  %s21_s19 = sadd.s32 1, %s767_s19   ;;  %s1128_s28 = sld [smem:[#allocation15_spill]] }
  0x9e   : > { %p18_p10 = scmp.ge.s32.totalorder %s21_s19, 6   ;;  %s1129_s12 = smov %s743_s13 }
  0x9f   : > { %s1130_s13 = smov %s747_s14  ;;  %s1131_s14 = smov %s918_s1 }
  0xa0   : > { %s1132_s15 = smov %s759_s17  ;;  %s1133_s16 = smov %s763_s18 }
  0xa1   : > { %s1135_s18 = smov %s1141_s4  ;;  %20 = sbr.rel (!%p18_p10) target bundleno = 12 (0xc), region = 87 }
  0xa3   : > { %s1134_s17 = smov %s1128_s28 }
  0xa8   :  { %376 = vsyncpa [#allocation3], 1 }
  0xa9   :  { %378 = vsyncpa [#allocation3 + $0x1], 1 }
  0xaa   :  { %379 = vsyncpa [#allocation4], 1 }
  0xab   :  { %381 = vsyncpa [#allocation4 + $0x1], 1 }
  0xac   :  { %382 = vsyncpa [#allocation5], 1 }
  0xad   :  { %384 = vsyncpa [#allocation5 + $0x1], 1 }
  0xae   :  { %385 = vsyncpa [#allocation6], 1 }
  0xaf   :  { %387 = vsyncpa [#allocation6 + $0x1], 1 }

</bundles_post_ra>
